<compile_context>
chip_gen: v6e
topology: v6e:2x2x1
jax: 0.10.0
libtpu: 0.0.40
codegen_flags: <defaults>
</compile_context>

<pallas_src>
import jax
import jax.numpy as jnp
from jax.experimental import pallas as pl
from jax.experimental.pallas import tpu as pltpu


def _multiplier_kernel(x_ref, m_ref, o_ref):
    # x_ref: (row_t, col_t) lane-dense tile in VMEM.
    # m_ref: (row_t, 1) per-row multiplicand column (broadcasts along lanes).
    o_ref[...] = (x_ref[...] * m_ref[...]).astype(o_ref.dtype)


def _tile_budget_bytes():
    """Generation-aware (input-tile budget, VMEM ceiling) in bytes."""
    kind = ""
    try:
        kind = jax.devices()[0].device_kind.lower()
    except Exception:
        pass
    if "v7" in kind or "7x" in kind:
        # 3.2 TB/s HBM: 8 MiB tile keeps the fixed per-step cost < ~7%;
        # double-buffered in+out (~33 MiB) fits well inside 64 MiB physical
        # VMEM; cap the scoped limit at 48 MiB to leave headroom.
        return 8 * 1024 * 1024, 48 * 1024 * 1024
    if "v6" in kind:
        # ~1.4 TB/s: a 2 MiB tile is already ~85% of roofline; stay well under
        # the 32 MiB scoped-VMEM default.
        return 2 * 1024 * 1024, 28 * 1024 * 1024
    # v5e / unknown: keep near ~12 MiB, under the 16 MiB scoped default.
    return 2 * 1024 * 1024, 12 * 1024 * 1024


def _sublane_multiple(itemsize):
    # Packed-sublane vreg tile: f32 -> 8, bf16/f16 -> 16, int8/fp8 -> 32 rows.
    return max(8, 32 // max(1, int(itemsize)))


def _choose_block(num_rows, num_cols, itemsize, sublane, budget_bytes):
    """Pick a (row, col) block: lane/sublane aligned, roughly `budget_bytes`."""
    # Column (lane, minor-most) tile: prefer the full extent (the full-dim
    # exception always satisfies the 128-lane rule); only split when a single
    # sublane-deep stripe of full columns would blow the budget.
    if sublane * num_cols * itemsize <= budget_bytes or num_cols < 128:
        col = num_cols
    else:
        col = max(128, ((budget_bytes // (sublane * itemsize)) // 128) * 128)
        col = min(col, (num_cols // 128) * 128)

    rows_budget = max(1, budget_bytes // (col * itemsize))
    row = min(rows_budget, num_rows)

    # Megacore (v7x): guarantee >= 2 steps on the parallel row axis whenever
    # the row extent is splittable into aligned halves.
    if num_rows >= 2 * sublane:
        row = min(row, pl.cdiv(num_rows, 2))

    if row >= sublane:
        row = (row // sublane) * sublane      # dtype-packed sublane alignment
    elif row < num_rows:
        row = min(sublane, num_rows)          # avoid sub-sublane partial tiles
    else:
        row = num_rows                        # full-dim exception
    return row, col


def multiplier_forward(x, multiplicand):
    """x: (N, C, H, W), multiplicand: (C, 1, 1) -> x * multiplicand."""
    N, C, H, W = x.shape
    R, L = N * C, H * W
    out_dtype = jnp.result_type(x.dtype, jnp.asarray(multiplicand).dtype)

    # Lane-dense 2D view of x; per-row multiplicand column (row r = n*C + c
    # gets multiplicand[c]). Wrapper-side layout plumbing only.
    x2 = x.reshape(R, L)
    m_col = jnp.broadcast_to(
        jnp.asarray(multiplicand, out_dtype).reshape(1, C), (N, C)
    ).reshape(R, 1)

    in_itemsize = jnp.dtype(x.dtype).itemsize
    out_itemsize = jnp.dtype(out_dtype).itemsize
    budget, vmem_cap = _tile_budget_bytes()
    sublane = _sublane_multiple(min(in_itemsize, out_itemsize))
    row_t, col_t = _choose_block(
        R, L, max(in_itemsize, out_itemsize), sublane, budget
    )

    # VMEM accounting: double-buffered x + out tiles, plus the (row_t, 1)
    # multiplicand column which is lane-padded to (row_t, 128) in VMEM and
    # double-buffered, plus slack for Mosaic internals.
    block_bytes = row_t * col_t * (in_itemsize + out_itemsize)
    m_pad_bytes = row_t * 128 * out_itemsize
    vmem_limit = int(
        min(vmem_cap,
            max(8 * 1024 * 1024,
                2 * block_bytes + 2 * m_pad_bytes + 2 * 1024 * 1024))
    )

    # Pure elementwise op with identical in/out shape: alias the output onto
    # x's buffer when no dtype promotion happens.
    aliases = {0: 0} if out_dtype == x.dtype else {}

    cost = pl.CostEstimate(
        flops=R * L,
        transcendentals=0,
        bytes_accessed=R * L * (in_itemsize + out_itemsize) + R * out_itemsize,
    )

    if col_t == L:
        # Full lane-dense column block: collapse to a 1D (row) grid and drop
        # the size-1 inner axis bookkeeping.
        grid_spec = pltpu.PrefetchScalarGridSpec(
            num_scalar_prefetch=0,
            grid=(pl.cdiv(R, row_t),),
            in_specs=[
                pl.BlockSpec((row_t, col_t), lambda i: (i, 0)),
                pl.BlockSpec((row_t, 1), lambda i: (i, 0)),
            ],
            out_specs=pl.BlockSpec((row_t, col_t), lambda i: (i, 0)),
        )
        dim_sem = ("parallel",)
    else:
        grid_spec = pltpu.PrefetchScalarGridSpec(
            num_scalar_prefetch=0,
            grid=(pl.cdiv(R, row_t), pl.cdiv(L, col_t)),
            in_specs=[
                pl.BlockSpec((row_t, col_t), lambda i, j: (i, j)),
                # Same block index along j -> m column stays resident.
                pl.BlockSpec((row_t, 1), lambda i, j: (i, 0)),
            ],
            out_specs=pl.BlockSpec((row_t, col_t), lambda i, j: (i, j)),
        )
        dim_sem = ("parallel", "parallel")

    out2 = pl.pallas_call(
        _multiplier_kernel,
        out_shape=jax.ShapeDtypeStruct((R, L), out_dtype),
        grid_spec=grid_spec,
        compiler_params=pltpu.CompilerParams(
            dimension_semantics=dim_sem,
            vmem_limit_bytes=vmem_limit,
        ),
        cost_estimate=cost,
        input_output_aliases=aliases,
    )(x2, m_col)

    return out2.reshape(N, C, H, W)


if __name__ == "__main__":
    key = jax.random.PRNGKey(0)
    kx, km = jax.random.split(key)

    N, C, H, W = 2, 4, 16, 16
    x = jax.random.normal(kx, (N, C, H, W), dtype=jnp.float32)
    # Deterministic "parameter": per-channel multiplicand (like nn.Parameter).
    multiplicand = jax.random.normal(km, (C, 1, 1), dtype=jnp.float32)

    out = multiplier_forward(x, multiplicand)
    out = jax.block_until_ready(out)

    # Reference check against plain JAX broadcasting (same semantics as torch).
    ref = x * multiplicand
    assert out.shape == ref.shape
    assert out.dtype == ref.dtype
    assert jnp.allclose(out, ref, atol=1e-6, rtol=1e-6)

    print("KERNEL_OK")
</pallas_src>

<mosaic_0001>
module attributes {stable_mosaic.version = 11 : i64} {
  func.func @_multiplier_kernel(%arg0: i32, %arg1: memref<8x256xf32, #tpu.memory_space<vmem>>, %arg2: memref<8x1xf32, #tpu.memory_space<vmem>>, %arg3: memref<8x256xf32, #tpu.memory_space<vmem>>) attributes {dimension_semantics = [#tpu.dimension_semantics<parallel>], iteration_bounds = array<i64: 1>, scalar_prefetch = 0 : i64, scratch_operands = 0 : i64, tpu.core_type = #tpu.core_type<tc>, window_params = [{transform_indices = @transform_0, window_bounds = array<i64: 8, 256>}, {transform_indices = @transform_1, window_bounds = array<i64: 8, 1>}, {transform_indices = @transform_2, window_bounds = array<i64: 8, 256>}]} {
    %c0 = arith.constant 0 : index
    %c0_0 = arith.constant 0 : index
    %0 = vector.load %arg1[%c0, %c0_0] : memref<8x256xf32, #tpu.memory_space<vmem>>, vector<8x256xf32>
    %c0_1 = arith.constant 0 : index
    %c0_2 = arith.constant 0 : index
    %1 = vector.load %arg2[%c0_1, %c0_2] : memref<8x1xf32, #tpu.memory_space<vmem>>, vector<8x1xf32>
    %2 = vector.broadcast %1 : vector<8x1xf32> to vector<8x256xf32>
    %3 = arith.mulf %0, %2 : vector<8x256xf32>
    %c0_3 = arith.constant 0 : index
    %c0_4 = arith.constant 0 : index
    %4 = vector.load %arg3[%c0_3, %c0_4] : memref<8x256xf32, #tpu.memory_space<vmem>>, vector<8x256xf32>
    tpu.vector_store %arg3[%c0_3, %c0_4], %3 {strides = array<i32>} : memref<8x256xf32, #tpu.memory_space<vmem>>, vector<8x256xf32>,
    return
  }
  func.func @transform_0(%arg0: i32) -> (i32, i32) {
    %c0_i32 = arith.constant 0 : i32
    %c0_i32_0 = arith.constant 0 : i32
    return %arg0, %c0_i32 : i32, i32
  }
  func.func @transform_1(%arg0: i32) -> (i32, i32) {
    %c0_i32 = arith.constant 0 : i32
    %c0_i32_0 = arith.constant 0 : i32
    return %arg0, %c0_i32 : i32, i32
  }
  func.func @transform_2(%arg0: i32) -> (i32, i32) {
    %c0_i32 = arith.constant 0 : i32
    %c0_i32_0 = arith.constant 0 : i32
    return %arg0, %c0_i32 : i32, i32
  }
}

</mosaic_0001>

<bundles_post_ra>
// kernel: tpu_custom_call.1
= control target key start
LH: loop header
LB: loop body
LE: loop exit
PB: predicated region body
PF: predicated region fallthrough
CT: control target
= control target key end

     0   :  { %7 = vsyncpa [#allocation3], 0  ;;  %s126_s0 = inlined_call_operand.hbm [shape: f32[8,256], index: 0, kind: input, shape index: {}, may-alias: {0,2}]   ;;  %s127_s1 = inlined_call_operand.vmem [shape: f32[8,1], index: 1, kind: input, shape index: {}]   ;;  %s128_s2 = inlined_call_operand.hbm [shape: f32[8,256], index: 2, kind: output, shape index: {}, may-alias: {0,2}]  }
   0x1   :  { %8 = vsyncpa [#allocation4], 0  ;;  %s99_s9 = smov [#allocation2]  }
   0x2   :  { %s15_s10 = sshll.u32 %s99_s9, 4  ;;  %s16_s10 = int_to_ptr.vmem [resolvable:$true] %s15_s10 }
   0x3   :  { %s63_s11 = scalar_lea.vmem %s16_s10, 256  ;;  %p68_p1 = scmp.lt.s32.totalorder %s16_s10, %s16_s10 }
   0x4   :  { %p64_p0 = scmp.ne.s32.totalorder %s16_s10, %s63_s11  ;;  %p69_p2 = scmp.lt.s32.totalorder %s63_s11, %s63_s11 }
   0x6   :  { %p70_p3 = por %p69_p2, %p68_p1 }
   0x8   :  { %p71_p4 = pnand %p70_p3, %p64_p0 }
   0xa   :  { %74 = shalt.err (!%p71_p4)
}
   0xb   :  { %18 = dma.hbm_to_vmem [thread:$0]  %s126_s0, 256, %s16_s10, [#allocation3]  }
   0xc   :  { %95 = dma.done.wait [#allocation3], 256  }
   0xd   :  { %96 = vsyncadd [#allocation3], 4294967040  ;;  %v100_v0 = vmov 0   ;;  %v26_v1 = vld [vmem:[%s127_s1] sm:$0xff]  ;;  %v25_v3 = vld [vmem:[#allocation2 + $0x8] sm:$0xff]  ;;  %s101_s16 = smov [#allocation5]  }
   0xe   :  { %54 = vset.pattern.permute.xlu0 %v100_v0  ;;  %v24_v2 = vld [vmem:[#allocation2] sm:$0xff]  ;;  %s42_s17 = sshll.u32 %s101_s16, 4  ;;  %s43_s17 = int_to_ptr.vmem [resolvable:$true] %s42_s17 }
   0xf   :  { %29 = vperm.xlu0 %54, %v26_v1   ;;  %s75_s0 = scalar_lea.vmem %s43_s17, 256  ;;  %p80_p6 = scmp.lt.s32.totalorder %s43_s17, %s43_s17 }
  0x10   :  { %p76_p5 = scmp.ne.s32.totalorder %s43_s17, %s75_s0  ;;  %p81_p7 = scmp.lt.s32.totalorder %s75_s0, %s75_s0 }
  0x12   :  { %p82_p8 = por %p81_p7, %p80_p6 }
  0x14   :  { %p83_p9 = pnand %p82_p8, %p76_p5 }
  0x8a   :  { %v30_v4 = vpop.permute.xlu0 %29 }
  0x8b   :  { %v32_v5 = vmul.f32 %v30_v4, %v24_v2  ;;  %v33_v6 = vmul.f32 %v30_v4, %v25_v3 }
  0x8d   :  { %34 = vst [vmem:[#allocation5] sm:$0xff] %v32_v5  ;;  %35 = vst [vmem:[#allocation5 + $0x8] sm:$0xff] %v33_v6 }
  0x8e   :  { %86 = shalt.err (!%p83_p9)
}
  0x8f   :  { %45 = dma.vmem_to_hbm [thread:$0]  %s43_s17, 256, %s128_s2, [#allocation4]  }
  0x90   :  { %97 = dma.done.wait [#allocation4], 256  }
  0x91   :  { %98 = vsyncadd [#allocation4], 4294967040 }
  0x92   :  { %49 = vsyncpa [#allocation3], 1 }
  0x93   :  { %50 = vsyncpa [#allocation4], 1 }

</bundles_post_ra>
